<compile_context>
chip_gen: v7x
topology: tpu7x:2x2x1
jax: 0.10.0
libtpu: 0.0.40
codegen_flags: <defaults>
</compile_context>

<pallas_src>
import functools

import jax
import jax.numpy as jnp
from jax.experimental import pallas as pl
from jax.experimental.pallas import tpu as pltpu


# --------------------------------------------------------------------------
# small helpers
# --------------------------------------------------------------------------
def _round_up(x, m):
    return (x + m - 1) // m * m


def _sublane_multiple(dtype):
    nbytes = jnp.dtype(dtype).itemsize
    if nbytes >= 4:
        return 8
    if nbytes == 2:
        return 16
    return 32


def _divisor_tile(i_pad, target):
    """Largest multiple of 128 that is <= target and divides i_pad."""
    t = min(_round_up(max(target, 128), 128), i_pad)
    while t > 128 and i_pad % t != 0:
        t -= 128
    return t


def _tpu_vmem_capacity():
    try:
        return int(pltpu.get_tpu_info().vmem_capacity_bytes)
    except Exception:
        return None


def _chip_defaults():
    """Per-chip tile / VMEM-budget defaults (roofline driven)."""
    cap = _tpu_vmem_capacity()
    if cap is None:
        # Unknown chip: conservative but still decent arithmetic intensity.
        return dict(tm_prefill=512, ti=512, vmem_limit=None, budget=32 * 2**20)
    if cap <= 80 * 2**20:
        # v7x-class: 64 MiB VMEM per TensorCore, needs tm >= ~300 FLOPs/byte.
        limit = min(48 * 2**20, (cap * 3) // 4)
        return dict(tm_prefill=384, ti=256, vmem_limit=limit,
                    budget=int(limit * 0.85))
    # 128 MiB chips (v5e / v6e).  v6e roofline wants tm >= ~650.
    limit = min(100 * 2**20, cap - 16 * 2**20)
    return dict(tm_prefill=640, ti=512, vmem_limit=limit,
                budget=int(limit * 0.85))


def _pick_tiles(T, H, I_pad, x_dtype, w_dtype, cfg, tm, ti):
    """Choose (tm_eff, ti_eff) honoring dtype sublanes, chip roofline & VMEM."""
    sub = _sublane_multiple(x_dtype)
    tm_target = cfg["tm_prefill"] if tm is None else tm
    tm_target = max(sub, _round_up(tm_target, sub))
    tm_eff = min(tm_target, _round_up(T, sub))

    ti_target = cfg["ti"] if ti is None else ti
    ti_eff = _divisor_tile(I_pad, ti_target)

    xb = jnp.dtype(x_dtype).itemsize
    wb = jnp.dtype(w_dtype).itemsize

    def footprint(tm_, ti_):
        # x + out single-buffered, f32 accumulator, 3 double-buffered weights.
        act = tm_ * H * (2 * xb + 4)
        wgt = 3 * 2 * H * ti_ * wb
        return act + wgt

    budget = cfg["budget"]
    while tm_eff > sub and footprint(tm_eff, ti_eff) > budget:
        tm_eff = max(sub, _round_up(tm_eff // 2, sub))
    while ti_eff > 128 and footprint(tm_eff, ti_eff) > budget:
        ti_eff = _divisor_tile(I_pad, ti_eff - 128)
    return tm_eff, ti_eff


# --------------------------------------------------------------------------
# weight preparation (call ONCE at weight-load time, not per forward)
# --------------------------------------------------------------------------
def prepare_dots1_mlp_weights(w_gate_up, w_down):
    """Split merged [H, 2I] gate_up and zero-pad I to a multiple of 128.

    Zero padding is exact: silu(0) * 0 == 0 and the padded down-proj rows are
    zero, so the padded contribution to the output is zero.
    """
    H, two_i = w_gate_up.shape
    I = two_i // 2
    assert w_down.shape == (I, H)
    I_pad = _round_up(I, 128)
    w_gate = w_gate_up[:, :I]
    w_up = w_gate_up[:, I:]
    if I_pad != I:
        w_gate = jnp.pad(w_gate, ((0, 0), (0, I_pad - I)))
        w_up = jnp.pad(w_up, ((0, 0), (0, I_pad - I)))
        w_down = jnp.pad(w_down, ((0, I_pad - I), (0, 0)))
    return w_gate, w_up, w_down


# --------------------------------------------------------------------------
# kernel
# --------------------------------------------------------------------------
def _dots1_mlp_kernel(x_ref, wg_ref, wu_ref, wd_ref, o_ref, acc_ref):
    # x_ref  : (tm, H)       token tile (resident across the I axis)
    # wg_ref : (H, ti)       gate weight column block (streamed)
    # wu_ref : (H, ti)       up weight column block   (streamed)
    # wd_ref : (ti, H)       down weight row block    (streamed)
    # o_ref  : (tm, H)       output tile (resident across the I axis)
    # acc_ref: (tm, H) f32   accumulator scratch
    j = pl.program_id(1)

    @pl.when(j == 0)
    def _():
        acc_ref[...] = jnp.zeros_like(acc_ref)

    x = x_ref[...]
    gate = jnp.dot(x, wg_ref[...], preferred_element_type=jnp.float32)
    up = jnp.dot(x, wu_ref[...], preferred_element_type=jnp.float32)

    # SiluAndMul in f32: sigmoid goes to the EUP slot, the muls fill spare
    # VALU slots -- effectively free once the kernel is MXU-bound.
    hidden = (gate * jax.nn.sigmoid(gate)) * up

    acc_ref[...] += jnp.dot(
        hidden.astype(wd_ref.dtype),
        wd_ref[...],
        preferred_element_type=jnp.float32,
    )

    @pl.when(j == pl.num_programs(1) - 1)
    def _():
        o_ref[...] = acc_ref[...].astype(o_ref.dtype)


# --------------------------------------------------------------------------
# jitted pallas_call wrapper
# --------------------------------------------------------------------------
@functools.partial(
    jax.jit,
    static_argnames=("tm", "ti", "weight_buffers", "use_buffered",
                     "vmem_limit_bytes"),
)
def _dots1_mlp_call(x, w_gate, w_up, w_down, *, tm, ti, weight_buffers,
                    use_buffered, vmem_limit_bytes):
    T, H = x.shape
    I_pad = w_gate.shape[1]
    assert I_pad % ti == 0

    T_pad = _round_up(T, tm)
    if T_pad != T:
        x = jnp.pad(x, ((0, T_pad - T), (0, 0)))
    grid = (T_pad // tm, I_pad // ti)

    def spec(shape, index_map, buffers):
        if use_buffered:
            return pl.BlockSpec(shape, index_map,
                                pipeline_mode=pl.Buffered(buffers))
        return pl.BlockSpec(shape, index_map)

    in_specs = [
        spec((tm, H), lambda i, j: (i, 0), 1),              # x (resident in j)
        spec((H, ti), lambda i, j: (0, j), weight_buffers),  # gate block
        spec((H, ti), lambda i, j: (0, j), weight_buffers),  # up block
        spec((ti, H), lambda i, j: (j, 0), weight_buffers),  # down block
    ]
    out_spec = spec((tm, H), lambda i, j: (i, 0), 1)

    xbytes = jnp.dtype(x.dtype).itemsize
    wbytes = jnp.dtype(w_gate.dtype).itemsize
    cost = pl.CostEstimate(
        flops=6 * T_pad * H * I_pad,                          # 3 matmuls
        transcendentals=T_pad * I_pad,                        # sigmoid
        bytes_accessed=(2 * T_pad * H * xbytes                # x in + out
                        + 3 * H * I_pad * wbytes * grid[0]),  # streamed weights
    )

    cp_kwargs = dict(dimension_semantics=("parallel", "arbitrary"))
    if vmem_limit_bytes is not None:
        cp_kwargs["vmem_limit_bytes"] = int(vmem_limit_bytes)

    out = pl.pallas_call(
        _dots1_mlp_kernel,
        out_shape=jax.ShapeDtypeStruct((T_pad, H), x.dtype),
        grid_spec=pltpu.PrefetchScalarGridSpec(
            num_scalar_prefetch=0,
            grid=grid,
            in_specs=in_specs,
            out_specs=out_spec,
            scratch_shapes=[pltpu.VMEM((tm, H), jnp.float32)],
        ),
        compiler_params=pltpu.CompilerParams(**cp_kwargs),
        cost_estimate=cost,
    )(x, w_gate, w_up, w_down)

    return out[:T] if T_pad != T else out


def dots1_mlp(x, w_gate, w_up, w_down, *, tm=None, ti=None):
    """Fused Dots1MLP forward on pre-prepared weights.

    x:       [T, H]
    w_gate:  [H, I_pad]   (from prepare_dots1_mlp_weights)
    w_up:    [H, I_pad]
    w_down:  [I_pad, H]
    returns: [T, H]
    """
    T, H = x.shape
    I_pad = w_gate.shape[1]
    assert w_up.shape == (H, I_pad) and w_down.shape == (I_pad, H)
    assert I_pad % 128 == 0, "use prepare_dots1_mlp_weights() first"

    cfg = _chip_defaults()
    tm_eff, ti_eff = _pick_tiles(T, H, I_pad, x.dtype, w_gate.dtype, cfg, tm, ti)
    n_token_tiles = _round_up(T, tm_eff) // tm_eff
    # Decode regime (single token tile) = pure weight streaming: deepen the
    # weight prefetch; prefill: standard double-buffering.
    weight_buffers = 3 if n_token_tiles == 1 else 2

    kwargs = dict(tm=tm_eff, ti=ti_eff, weight_buffers=weight_buffers,
                  vmem_limit_bytes=cfg["vmem_limit"])
    if hasattr(pl, "Buffered"):
        try:
            return _dots1_mlp_call(x, w_gate, w_up, w_down,
                                   use_buffered=True, **kwargs)
        except Exception:
            pass  # fall back to default buffering if pipeline_mode unsupported
    return _dots1_mlp_call(x, w_gate, w_up, w_down, use_buffered=False, **kwargs)


def dots1_mlp_from_merged(x, w_gate_up, w_down, *, tm=None, ti=None):
    """Convenience path matching the PyTorch layout (merged gate_up weight).

    In real serving, call prepare_dots1_mlp_weights() once at weight-load time
    and use dots1_mlp() directly in the forward pass.
    """
    w_gate, w_up, w_down_p = prepare_dots1_mlp_weights(w_gate_up, w_down)
    return dots1_mlp(x, w_gate, w_up, w_down_p, tm=tm, ti=ti)


# --------------------------------------------------------------------------
# reference + tests
# --------------------------------------------------------------------------
def _reference_mlp(x, w_gate_up, w_down):
    gate_up = jnp.dot(x.astype(jnp.float32), w_gate_up.astype(jnp.float32))
    inter = w_down.shape[0]
    gate, up = gate_up[:, :inter], gate_up[:, inter:]
    hidden = jax.nn.silu(gate) * up
    return jnp.dot(hidden, w_down.astype(jnp.float32)).astype(x.dtype)


if __name__ == "__main__":
    key = jax.random.PRNGKey(0)

    # --- test 1: small module-consistent shapes; decode regime (T=12) ---
    hidden_size = 32
    intermediate_size = 64
    num_tokens = 12
    dtype = jnp.float32

    kx, kgu, kd, kx2, kgu2, kd2 = jax.random.split(key, 6)
    x = jax.random.normal(kx, (num_tokens, hidden_size), dtype=dtype)
    w_gate_up = (
        jax.random.normal(kgu, (hidden_size, 2 * intermediate_size), dtype=dtype)
        * 0.05
    )
    w_down = (
        jax.random.normal(kd, (intermediate_size, hidden_size), dtype=dtype) * 0.05
    )

    # Weight prep happens once (load time), then the forward uses it directly.
    wg, wu, wd = prepare_dots1_mlp_weights(w_gate_up, w_down)
    wg, wu, wd = jax.block_until_ready((wg, wu, wd))

    out = dots1_mlp(x, wg, wu, wd)
    out = jax.block_until_ready(out)
    ref = _reference_mlp(x, w_gate_up, w_down)
    assert out.shape == (num_tokens, hidden_size)
    assert jnp.allclose(out, ref, atol=2e-3, rtol=2e-3), "mismatch vs reference (t1)"

    # --- test 2: exercise the tiled-intermediate + multi-token-tile path ---
    H2, I2, T2 = 128, 256, 16
    x2 = jax.random.normal(kx2, (T2, H2), dtype=dtype)
    wgu2 = jax.random.normal(kgu2, (H2, 2 * I2), dtype=dtype) * 0.05
    wd2 = jax.random.normal(kd2, (I2, H2), dtype=dtype) * 0.05

    out2 = dots1_mlp_from_merged(x2, wgu2, wd2, tm=8, ti=128)  # grid (2, 2)
    out2 = jax.block_until_ready(out2)
    ref2 = _reference_mlp(x2, wgu2, wd2)
    assert out2.shape == (T2, H2)
    assert jnp.allclose(out2, ref2, atol=2e-3, rtol=2e-3), "mismatch vs reference (t2)"

    print("KERNEL_OK")
</pallas_src>

<mosaic_0001>
module attributes {stable_mosaic.version = 11 : i64} {
  func.func @_dots1_mlp_kernel(%arg0: i32, %arg1: i32, %arg2: memref<16x32xf32, #tpu.memory_space<vmem>>, %arg3: memref<32x128xf32, #tpu.memory_space<vmem>>, %arg4: memref<32x128xf32, #tpu.memory_space<vmem>>, %arg5: memref<128x32xf32, #tpu.memory_space<vmem>>, %arg6: memref<16x32xf32, #tpu.memory_space<vmem>>, %arg7: memref<16x32xf32, #tpu.memory_space<vmem>>) attributes {dimension_semantics = [#tpu.dimension_semantics<parallel>, #tpu.dimension_semantics<arbitrary>], iteration_bounds = array<i64: 1, 1>, scalar_prefetch = 0 : i64, scratch_operands = 1 : i64, tpu.core_type = #tpu.core_type<tc>, window_params = [{transform_indices = @transform_0, window_bounds = array<i64: 16, 32>}, {transform_indices = @transform_1, window_bounds = array<i64: 32, 128>}, {transform_indices = @transform_2, window_bounds = array<i64: 32, 128>}, {transform_indices = @transform_3, window_bounds = array<i64: 128, 32>}, {transform_indices = @transform_4, window_bounds = array<i64: 16, 32>}]} {
    %c0_i32 = arith.constant 0 : i32
    %0 = arith.cmpi eq, %arg1, %c0_i32 : i32
    %1 = arith.extui %0 : i1 to i32
    %c0_i32_0 = arith.constant 0 : i32
    %2 = arith.cmpi ne, %1, %c0_i32_0 : i32
    scf.if %2 {
      %cst_17 = arith.constant 0.000000e+00 : f32
      %23 = vector.broadcast %cst_17 : f32 to vector<16x32xf32>
      %c0_18 = arith.constant 0 : index
      %c0_19 = arith.constant 0 : index
      %24 = vector.load %arg7[%c0_18, %c0_19] : memref<16x32xf32, #tpu.memory_space<vmem>>, vector<16x32xf32>
      tpu.vector_store %arg7[%c0_18, %c0_19], %23 {strides = array<i32>} : memref<16x32xf32, #tpu.memory_space<vmem>>, vector<16x32xf32>,
    } else {
    }
    %c0 = arith.constant 0 : index
    %c0_1 = arith.constant 0 : index
    %3 = vector.load %arg2[%c0, %c0_1] : memref<16x32xf32, #tpu.memory_space<vmem>>, vector<16x32xf32>
    %c0_2 = arith.constant 0 : index
    %c0_3 = arith.constant 0 : index
    %4 = vector.load %arg3[%c0_2, %c0_3] : memref<32x128xf32, #tpu.memory_space<vmem>>, vector<32x128xf32>
    %cst = arith.constant dense<0.000000e+00> : vector<16x128xf32>
    %5 = tpu.matmul %3, %4, %cst {dimension_numbers = #tpu.dot_dimension_numbers<[1], [0], [0], [1], [0, 0, 1, 1], [], []>} : vector<16x32xf32>, vector<32x128xf32>, vector<16x128xf32> -> vector<16x128xf32>
    %c0_4 = arith.constant 0 : index
    %c0_5 = arith.constant 0 : index
    %6 = vector.load %arg4[%c0_4, %c0_5] : memref<32x128xf32, #tpu.memory_space<vmem>>, vector<32x128xf32>
    %cst_6 = arith.constant dense<0.000000e+00> : vector<16x128xf32>
    %7 = tpu.matmul %3, %6, %cst_6 {dimension_numbers = #tpu.dot_dimension_numbers<[1], [0], [0], [1], [0, 0, 1, 1], [], []>} : vector<16x32xf32>, vector<32x128xf32>, vector<16x128xf32> -> vector<16x128xf32>
    %8 = arith.negf %5 : vector<16x128xf32>
    %9 = math.exp %8 : vector<16x128xf32>
    %cst_7 = arith.constant 1.000000e+00 : f32
    %10 = vector.broadcast %cst_7 : f32 to vector<16x128xf32>
    %11 = arith.addf %10, %9 : vector<16x128xf32>
    %12 = arith.divf %10, %11 : vector<16x128xf32>
    %13 = arith.mulf %5, %12 : vector<16x128xf32>
    %14 = arith.mulf %13, %7 : vector<16x128xf32>
    %c0_8 = arith.constant 0 : index
    %c0_9 = arith.constant 0 : index
    %15 = vector.load %arg7[%c0_8, %c0_9] : memref<16x32xf32, #tpu.memory_space<vmem>>, vector<16x32xf32>
    %c0_10 = arith.constant 0 : index
    %c0_11 = arith.constant 0 : index
    %16 = vector.load %arg5[%c0_10, %c0_11] : memref<128x32xf32, #tpu.memory_space<vmem>>, vector<128x32xf32>
    %cst_12 = arith.constant dense<0.000000e+00> : vector<16x32xf32>
    %17 = tpu.matmul %14, %16, %cst_12 {dimension_numbers = #tpu.dot_dimension_numbers<[1], [0], [0], [1], [0, 0, 1, 1], [], []>} : vector<16x128xf32>, vector<128x32xf32>, vector<16x32xf32> -> vector<16x32xf32>
    %18 = arith.addf %15, %17 : vector<16x32xf32>
    %c0_13 = arith.constant 0 : index
    %c0_14 = arith.constant 0 : index
    %19 = vector.load %arg7[%c0_13, %c0_14] : memref<16x32xf32, #tpu.memory_space<vmem>>, vector<16x32xf32>
    tpu.vector_store %arg7[%c0_13, %c0_14], %18 {strides = array<i32>} : memref<16x32xf32, #tpu.memory_space<vmem>>, vector<16x32xf32>,
    %c0_i32_15 = arith.constant 0 : i32
    %20 = arith.cmpi eq, %arg1, %c0_i32_15 : i32
    %21 = arith.extui %20 : i1 to i32
    %c0_i32_16 = arith.constant 0 : i32
    %22 = arith.cmpi ne, %21, %c0_i32_16 : i32
    scf.if %22 {
      %c0_17 = arith.constant 0 : index
      %c0_18 = arith.constant 0 : index
      %23 = vector.load %arg7[%c0_17, %c0_18] : memref<16x32xf32, #tpu.memory_space<vmem>>, vector<16x32xf32>
      %c0_19 = arith.constant 0 : index
      %c0_20 = arith.constant 0 : index
      %24 = vector.load %arg6[%c0_19, %c0_20] : memref<16x32xf32, #tpu.memory_space<vmem>>, vector<16x32xf32>
      tpu.vector_store %arg6[%c0_19, %c0_20], %23 {strides = array<i32>} : memref<16x32xf32, #tpu.memory_space<vmem>>, vector<16x32xf32>,
    } else {
    }
    return
  }
  func.func @transform_0(%arg0: i32, %arg1: i32) -> (i32, i32) {
    %c0_i32 = arith.constant 0 : i32
    %c0_i32_0 = arith.constant 0 : i32
    return %arg0, %c0_i32 : i32, i32
  }
  func.func @transform_1(%arg0: i32, %arg1: i32) -> (i32, i32) {
    %c0_i32 = arith.constant 0 : i32
    %c0_i32_0 = arith.constant 0 : i32
    return %c0_i32, %arg1 : i32, i32
  }
  func.func @transform_2(%arg0: i32, %arg1: i32) -> (i32, i32) {
    %c0_i32 = arith.constant 0 : i32
    %c0_i32_0 = arith.constant 0 : i32
    return %c0_i32, %arg1 : i32, i32
  }
  func.func @transform_3(%arg0: i32, %arg1: i32) -> (i32, i32) {
    %c0_i32 = arith.constant 0 : i32
    %c0_i32_0 = arith.constant 0 : i32
    return %arg1, %c0_i32 : i32, i32
  }
  func.func @transform_4(%arg0: i32, %arg1: i32) -> (i32, i32) {
    %c0_i32 = arith.constant 0 : i32
    %c0_i32_0 = arith.constant 0 : i32
    return %arg0, %c0_i32 : i32, i32
  }
}

</mosaic_0001>

<bundles_post_ra>
// kernel: _dots1_mlp_call.1
= control target key start
LH: loop header
LB: loop body
LE: loop exit
PB: predicated region body
PF: predicated region fallthrough
CT: control target
= control target key end

     0   :  { %vm22_vm0 = vcmask 261120   ;;  %s634_s0 = inlined_call_operand.vmem [shape: f32[16,32], index: 0, kind: input, shape index: {}]   ;;  %s635_s1 = inlined_call_operand.vmem [shape: f32[32,128], index: 1, kind: input, shape index: {}]   ;;  %s636_s2 = inlined_call_operand.vmem [shape: f32[32,128], index: 2, kind: input, shape index: {}]   ;;  %s637_s3 = inlined_call_operand.vmem [shape: f32[128,32], index: 3, kind: input, shape index: {}]   ;;  %s638_s4 = inlined_call_operand.hbm [shape: f32[16,32], index: 4, kind: output, shape index: {}]  }
   0x1   :  { %v27_v0 = vld [vmem:[%s635_s1] sm:$0xff]  ;;  %v28_v1 = vld [vmem:[%s635_s1 + $0x8] sm:$0xff]  ;;  %v29_v2 = vld [vmem:[%s635_s1 + $0x10] sm:$0xff] }
   0x2   :  { %v421_v3 = vpack.c.bf16 %v28_v1, %v27_v0  ;;  %v30_v4 = vld [vmem:[%s635_s1 + $0x18] sm:$0xff]  ;;  %v25_v5 = vld [vmem:[%s634_s0] sm:$0xff]  ;;  %v114_v8 = vld [vmem:[%s636_s2 + $0x8] sm:$0xff] }
   0x3   :  { %v425_v6 = vpack.c.bf16 %v30_v4, %v29_v2  ;;  %372 = vmatprep.mubr.msk.f32.mxu1 %vm22_vm0, %v25_v5  ;;  %v113_v7 = vld [vmem:[%s636_s2] sm:$0xff] }
   0x4   :  { %422 = vmatprep.subr.bf16.mxu1 %v421_v3 }
   0x5   :  { %9 = vsyncpa [#allocation4], 0  ;;  %424 = vmatpush3.bf16.msra.mxu1 %v421_v3  ;;  %v429_v9 = vpack.c.bf16 %v114_v8, %v113_v7  ;;  %v115_v10 = vld [vmem:[%s636_s2 + $0x10] sm:$0xff]  ;;  %v116_v11 = vld [vmem:[%s636_s2 + $0x18] sm:$0xff]  ;;  %v505_v38 = vmov 0.0  }
   0x6   :  { %426 = vmatprep.subr.bf16.mxu1 %v425_v6  ;;  %v26_v12 = vld [vmem:[%s634_s0 + $0x8] sm:$0xff]  ;;  %v433_v13 = vpack.c.bf16 %v116_v11, %v115_v10  ;;  %v210_v14 = vld [vmem:[%s637_s3] sm:$0xff]  ;;  %v212_v17 = vld [vmem:[%s637_s3 + $0x10] sm:$0xff]  ;;  %24 = vst.msk [vmem:[#allocation2 + $0x8] sm:$0xff] %vm22_vm0, %v505_v38 }
   0x7   :  { %v211_v15 = vld [vmem:[%s637_s3 + $0x8] sm:$0xff]  ;;  %v213_v18 = vld [vmem:[%s637_s3 + $0x18] sm:$0xff]  ;;  %v214_v20 = vld [vmem:[%s637_s3 + $0x20] sm:$0xff]  ;;  %23 = vst.msk [vmem:[#allocation2] sm:$0xff] %vm22_vm0, %v505_v38 }
   0x8   :  { %v437_v16 = vpack.c.bf16 %v211_v15, %v210_v14  ;;  %v441_v19 = vpack.c.bf16 %v213_v18, %v212_v17  ;;  %v215_v21 = vld [vmem:[%s637_s3 + $0x28] sm:$0xff]  ;;  %v216_v23 = vld [vmem:[%s637_s3 + $0x30] sm:$0xff]  ;;  %v217_v24 = vld [vmem:[%s637_s3 + $0x38] sm:$0xff] }
   0x9   :  { %428 = vmatpush3.bf16.msra.mxu1 %v425_v6  ;;  %v445_v22 = vpack.c.bf16 %v215_v21, %v214_v20  ;;  %v449_v25 = vpack.c.bf16 %v217_v24, %v216_v23  ;;  %v218_v26 = vld [vmem:[%s637_s3 + $0x40] sm:$0xff]  ;;  %v219_v27 = vld [vmem:[%s637_s3 + $0x48] sm:$0xff]  ;;  %v220_v29 = vld [vmem:[%s637_s3 + $0x50] sm:$0xff] }
   0xa   :  { %430 = vmatprep.subr.bf16.mxu1 %v429_v9  ;;  %438 = vmatprep.subr.bf16.mxu0 %v437_v16  ;;  %v453_v28 = vpack.c.bf16 %v219_v27, %v218_v26  ;;  %v221_v30 = vld [vmem:[%s637_s3 + $0x58] sm:$0xff]  ;;  %v222_v32 = vld [vmem:[%s637_s3 + $0x60] sm:$0xff]  ;;  %v223_v33 = vld [vmem:[%s637_s3 + $0x68] sm:$0xff] }
   0xb   :  { %440 = vmatpush3.bf16.msra.mxu0 %v437_v16  ;;  %v457_v31 = vpack.c.bf16 %v221_v30, %v220_v29  ;;  %v461_v34 = vpack.c.bf16 %v223_v33, %v222_v32  ;;  %v224_v35 = vld [vmem:[%s637_s3 + $0x70] sm:$0xff]  ;;  %v225_v36 = vld [vmem:[%s637_s3 + $0x78] sm:$0xff]  ;;  %s506_s3 = smov [#allocation3]  }
   0xc   :  { %373 = vmatmul.mubr.msk.f32.vlgmr.msra.gmra.mrb[0].mxu1 %vm22_vm0, %v26_v12  ;;  %442 = vmatprep.subr.bf16.mxu0 %v441_v19  ;;  %v465_v37 = vpack.c.bf16 %v225_v36, %v224_v35  ;;  %s317_s10 = sshll.u32 %s506_s3, 4  ;;  %s318_s10 = int_to_ptr.vmem [resolvable:$true] %s317_s10 }
   0xd   :  { %432 = vmatpush3.bf16.msra.mxu1 %v429_v9  ;;  %383 = vmatprep.mubr.msk.f32.mxu1 %vm22_vm0, %v25_v5  ;;  %v209_v55 = vld [vmem:[#allocation2 + $0x8] sm:$0xff]  ;;  %s481_s0 = scalar_lea.vmem %s318_s10, 256  ;;  %p486_p1 = scmp.lt.s32.totalorder %s318_s10, %s318_s10 }
   0xe   :  { %434 = vmatprep.subr.bf16.mxu1 %v433_v13  ;;  %v208_v56 = vld [vmem:[#allocation2] sm:$0xff]  ;;  %p482_p0 = scmp.ne.s32.totalorder %s318_s10, %s481_s0  ;;  %p487_p2 = scmp.lt.s32.totalorder %s481_s0, %s481_s0 }
   0xf   :  { %444 = vmatpush3.bf16.msra.mxu0 %v441_v19 }
  0x10   :  { %446 = vmatprep.subr.bf16.mxu0 %v445_v22  ;;  %p488_p3 = por %p487_p2, %p486_p1 }
  0x11   :  { %436 = vmatpush3.bf16.msra.mxu1 %v433_v13 }
  0x12   :  { %p489_p4 = pnand %p488_p3, %p482_p0 }
  0x13   :  { %448 = vmatpush3.bf16.msra.mxu0 %v445_v22 }
  0x14   :  { %384 = vmatmul.mubr.msk.f32.vlgmr.msra.gmra.mrb[2].mxu1 %vm22_vm0, %v26_v12  ;;  %450 = vmatprep.subr.bf16.mxu0 %v449_v25 }
  0x17   :  { %452 = vmatpush3.bf16.msra.mxu0 %v449_v25 }
  0x18   :  { %454 = vmatprep.subr.bf16.mxu0 %v453_v28 }
  0x1b   :  { %456 = vmatpush3.bf16.msra.mxu0 %v453_v28 }
  0x1c   :  { %458 = vmatprep.subr.bf16.mxu0 %v457_v31 }
  0x1f   :  { %460 = vmatpush3.bf16.msra.mxu0 %v457_v31 }
  0x20   :  { %462 = vmatprep.subr.bf16.mxu0 %v461_v34 }
  0x23   :  { %464 = vmatpush3.bf16.msra.mxu0 %v461_v34 }
  0x24   :  { %466 = vmatprep.subr.bf16.mxu0 %v465_v37 }
  0x27   :  { %468 = vmatpush3.bf16.msra.mxu0 %v465_v37 }
  0xdf   :  { %v374_v39 = vpop.f32.mrb[0].mxu1 }
  0xe0   :  { %v333_v40 = vmul.f32 -1.442695, %v374_v39  ;;  %v104_v41 = vpop.f32.mrb[1].mxu1 }
  0xe1   :  { %v332_v42 = vmul.f32 -1.442695, %v104_v41 }
  0xe2   :  { %473 = vpow2.f32 %v333_v40 }
  0xe3   :  { %475 = vpow2.f32 %v332_v42 }
  0xe7   :  { %v385_v43 = vpop.f32.mrb[2].mxu1 }
  0xe8   :  { %v183_v44 = vpop.f32.mrb[3].mxu1 }
  0xec   :  { %v474_v45 = vpop.eup %473 }
  0xed   :  { %v476_v46 = vpop.eup %475  ;;  %v199_v47 = vadd.f32 1.0, %v474_v45 }
  0xee   :  { %v198_v48 = vadd.f32 1.0, %v476_v46 }
  0xef   :  { %477 = vrcp.f32 %v199_v47 }
  0xf0   :  { %479 = vrcp.f32 %v198_v48 }
  0xf9   :  { %v478_v49 = vpop.eup %477 }
  0xfa   :  { %v480_v50 = vpop.eup %479  ;;  %v205_v51 = vmul.f32 %v478_v49, %v374_v39 }
  0xfb   :  { %v204_v52 = vmul.f32 %v480_v50, %v104_v41 }
  0xfc   :  { %v207_v53 = vmul.f32 %v385_v43, %v205_v51 }
  0xfd   :  { %v206_v54 = vmul.f32 %v204_v52, %v183_v44 }
  0xff   :  { %418 = vmatprep.mubr.f32.mxu0 %v206_v54 }
 0x100   :  { %419 = vmatmul.mubr.f32.vlgmr.msra.gmra.mrb[0].mxu0 %v207_v53 }
 0x1d3   :  { %v420_v57 = vpop.f32.mrb[0].mxu0 }
 0x1d4   :  { %v302_v58 = vadd.f32 %v420_v57, %v209_v55  ;;  %v292_v59 = vpop.f32.mrb[1].mxu0 }
 0x1d5   :  { %v301_v60 = vadd.f32 %v292_v59, %v208_v56 }
 0x1d6   :  { %304 = vst.msk [vmem:[#allocation2 + $0x8] sm:$0xff] %vm22_vm0, %v302_v58 }
 0x1d7   :  { %303 = vst.msk [vmem:[#allocation2] sm:$0xff] %vm22_vm0, %v301_v60 }
 0x1dd   :  { %v309_v61 = vld [vmem:[#allocation2 + $0x8] sm:$0xff] }
 0x1de   :  { %v308_v62 = vld [vmem:[#allocation2] sm:$0xff]  ;;  %311 = vst.msk [vmem:[#allocation3 + $0x8] sm:$0xff] %vm22_vm0, %v309_v61 }
 0x1df   :  { %310 = vst.msk [vmem:[#allocation3] sm:$0xff] %vm22_vm0, %v308_v62 }
 0x1e0   :  { %492 = shalt.err (!%p489_p4)
}
 0x1e1   :  { %s493_s13 = scalar_lea.hbm %s638_s4, 256 }
 0x1e2   :  { %p494_p5 = scmp.ne.s32.totalorder %s638_s4, %s493_s13  ;;  %p497_p6 = scmp.lt.u32.totalorder %s493_s13, %s638_s4 }
 0x1e4   :  { %p499_p7 = pnand %p497_p6, %p494_p5 }
 0x1e6   :  { %502 = shalt.err (!%p499_p7)
}
 0x1e7   :  { %s507_s18 = smov 128   ;;  %s508_s19 = smov 8  }
 0x1e8   :  { %323 = dma.vmem_to_hbm [thread:$0]  %s318_s10, 256, %s638_s4, [#allocation4], %s507_s18, %s507_s18, %s508_s19  }
 0x1e9   :  { %503 = dma.done.wait [#allocation4], 256  }
 0x1ea   :  { %504 = vsyncadd [#allocation4], 4294967040 }
 0x1eb   :  { %327 = vsyncpa [#allocation4], 1 }

</bundles_post_ra>
